<compile_context>
chip_gen: v5e
topology: v5e:2x2
jax: 0.10.0
libtpu: 0.0.40
codegen_flags: <defaults>
</compile_context>

<pallas_src>
import jax
import jax.numpy as jnp
from jax.experimental import pallas as pl
from jax.experimental.pallas import tpu as pltpu


def _h_swish_kernel(x_ref, o_ref):
    x = x_ref[...]                                   # (block_rows, lane_width)
    xf = x.astype(jnp.float32)                       # free for f32; cheap for bf16
    gate = jnp.clip(xf + 3.0, 0.0, 6.0) / 6.0        # h_sigmoid(x), f32
    o_ref[...] = (xf * gate).astype(o_ref.dtype)


def _pick_lane_width(aligned_total):
    """Largest lane width (multiple of 128) that divides the aligned size."""
    for lw in (4096, 2048, 1024, 512, 256, 128):
        if aligned_total % lw == 0:
            return lw
    return 128  # unreachable: aligned_total is a multiple of 128


def _h_swish_2d(x2, target_block_bytes):
    """Run the kernel on a (n_rows, lane_width) lane-dense slab."""
    n_rows, lane_width = x2.shape
    itemsize = x2.dtype.itemsize
    # Sublane tile per dtype: 8 rows (4B), 16 rows (2B), 32 rows (1B).
    sub_mult = max(8, 32 // itemsize)

    rows_target = max(int(target_block_bytes) // (lane_width * itemsize), sub_mult)
    if rows_target >= n_rows:
        block_rows = n_rows                          # single row-block (full dim ok)
    else:
        block_rows = max((rows_target // sub_mult) * sub_mult, sub_mult)

    grid = (pl.cdiv(n_rows, block_rows),)            # partial last block is masked

    block_bytes = block_rows * lane_width * itemsize
    # in+out double-buffered (4x) + elementwise intermediates + headroom,
    # clamped below v7x's 64 MiB physical VMEM.
    vmem_limit = min(max(8 * block_bytes + (8 << 20), 16 << 20), 48 << 20)

    return pl.pallas_call(
        _h_swish_kernel,
        out_shape=jax.ShapeDtypeStruct((n_rows, lane_width), x2.dtype),
        grid_spec=pltpu.PrefetchScalarGridSpec(
            num_scalar_prefetch=0,
            grid=grid,
            in_specs=[pl.BlockSpec((block_rows, lane_width), lambda i: (i, 0))],
            out_specs=pl.BlockSpec((block_rows, lane_width), lambda i: (i, 0)),
        ),
        compiler_params=pltpu.CompilerParams(
            dimension_semantics=("parallel",),
            vmem_limit_bytes=int(vmem_limit),
        ),
    )(x2)


def _h_swish_jax(x):
    """Plain-JAX h_swish (used only for tiny ragged tails / reference)."""
    xf = x.astype(jnp.float32)
    return (xf * (jnp.clip(xf + 3.0, 0.0, 6.0) / 6.0)).astype(x.dtype)


def h_swish_pallas(x, *, target_block_bytes=4 << 20):
    """Elementwise h_swish on an arbitrarily-shaped floating-point array."""
    if not jnp.issubdtype(x.dtype, jnp.floating):
        raise TypeError(f"h_swish_pallas expects a floating dtype, got {x.dtype}")

    orig_shape = x.shape
    total = int(x.size)
    if total == 0:
        return x

    flat = x.reshape(-1)                             # contiguous view, no copy
    rem = total % 128
    aligned = total - rem

    if aligned == 0:
        # Tiny tensor (< 128 elements): not worth a kernel launch.
        return _h_swish_jax(flat).reshape(orig_shape)

    lane_width = _pick_lane_width(aligned)
    body = flat if rem == 0 else flat[:aligned]
    body2 = body.reshape(aligned // lane_width, lane_width)   # view, no copy
    out_body = _h_swish_2d(body2, target_block_bytes).reshape(-1)

    if rem == 0:
        return out_body.reshape(orig_shape)

    # Ragged tail (< 128 elements): compute in plain JAX, stitch back on.
    tail_out = _h_swish_jax(flat[aligned:])
    return jnp.concatenate([out_body, tail_out]).reshape(orig_shape)


def h_swish_reference(x):
    """Pure-JAX reference matching the PyTorch module (f32 math)."""
    xf = x.astype(jnp.float32)
    return (xf * (jnp.clip(xf + 3.0, 0.0, 6.0) / 6.0)).astype(x.dtype)


if __name__ == "__main__":
    key = jax.random.PRNGKey(0)

    # Shape consistent with the (shape-agnostic) module; 2*4*16*16 = 2048
    # elements -> fast (view-only, no-pad) lane-dense path.
    N, C, H, W = 2, 4, 16, 16
    x = jax.random.normal(key, (N, C, H, W), dtype=jnp.float32) * 4.0  # span relu6 knees

    out = jax.block_until_ready(h_swish_pallas(x))
    ref = h_swish_reference(x)
    assert out.shape == x.shape
    assert out.dtype == x.dtype
    assert jnp.allclose(out, ref, atol=1e-5, rtol=1e-5)

    # Ragged total (3*7*33*19 = 13167): aligned-prefix kernel + plain-JAX tail.
    x2 = jax.random.normal(jax.random.PRNGKey(1), (3, 7, 33, 19), dtype=jnp.float32) * 4.0
    out2 = jax.block_until_ready(h_swish_pallas(x2))
    assert jnp.allclose(out2, h_swish_reference(x2), atol=1e-5, rtol=1e-5)

    # Multi-row-block path with a partial final block (15 rows, block of 8),
    # forced via a small target block size.
    x3 = jax.random.normal(jax.random.PRNGKey(2), (4, 3, 40, 128), dtype=jnp.float32) * 4.0
    out3 = jax.block_until_ready(h_swish_pallas(x3, target_block_bytes=128 * 1024))
    assert jnp.allclose(out3, h_swish_reference(x3), atol=1e-5, rtol=1e-5)

    # bf16 path (gate computed in f32 inside the kernel, cast back on store).
    xb = jax.random.normal(jax.random.PRNGKey(3), (N, C, H, W), dtype=jnp.bfloat16) * 4.0
    outb = jax.block_until_ready(h_swish_pallas(xb))
    assert outb.dtype == jnp.bfloat16
    assert jnp.allclose(outb.astype(jnp.float32),
                        h_swish_reference(xb).astype(jnp.float32),
                        atol=5e-2, rtol=5e-2)

    print("KERNEL_OK")
</pallas_src>

<mosaic_0001>
module attributes {stable_mosaic.version = 11 : i64} {
  func.func @_h_swish_kernel(%arg0: i32, %arg1: memref<1x2048xf32, #tpu.memory_space<vmem>>, %arg2: memref<1x2048xf32, #tpu.memory_space<vmem>>) attributes {dimension_semantics = [#tpu.dimension_semantics<parallel>], iteration_bounds = array<i64: 1>, scalar_prefetch = 0 : i64, scratch_operands = 0 : i64, tpu.core_type = #tpu.core_type<tc>, window_params = [{transform_indices = @transform_0, window_bounds = array<i64: 1, 2048>}, {transform_indices = @transform_1, window_bounds = array<i64: 1, 2048>}]} {
    %c0 = arith.constant 0 : index
    %c0_0 = arith.constant 0 : index
    %0 = vector.load %arg1[%c0, %c0_0] : memref<1x2048xf32, #tpu.memory_space<vmem>>, vector<1x2048xf32>
    %cst = arith.constant 3.000000e+00 : f32
    %1 = vector.broadcast %cst : f32 to vector<1x2048xf32>
    %2 = arith.addf %0, %1 : vector<1x2048xf32>
    %cst_1 = arith.constant 0.000000e+00 : f32
    %cst_2 = arith.constant 6.000000e+00 : f32
    %3 = vector.broadcast %cst_1 : f32 to vector<1x2048xf32>
    %4 = arith.maximumf %3, %2 : vector<1x2048xf32>
    %5 = vector.broadcast %cst_2 : f32 to vector<1x2048xf32>
    %6 = arith.minimumf %5, %4 : vector<1x2048xf32>
    %cst_3 = arith.constant 6.000000e+00 : f32
    %7 = vector.broadcast %cst_3 : f32 to vector<1x2048xf32>
    %8 = arith.divf %6, %7 : vector<1x2048xf32>
    %9 = arith.mulf %0, %8 : vector<1x2048xf32>
    %c0_4 = arith.constant 0 : index
    %c0_5 = arith.constant 0 : index
    %10 = vector.load %arg2[%c0_4, %c0_5] : memref<1x2048xf32, #tpu.memory_space<vmem>>, vector<1x2048xf32>
    tpu.vector_store %arg2[%c0_4, %c0_5], %9 {strides = array<i32>} : memref<1x2048xf32, #tpu.memory_space<vmem>>, vector<1x2048xf32>,
    return
  }
  func.func @transform_0(%arg0: i32) -> (i32, i32) {
    %c0_i32 = arith.constant 0 : i32
    %c0_i32_0 = arith.constant 0 : i32
    return %arg0, %c0_i32 : i32, i32
  }
  func.func @transform_1(%arg0: i32) -> (i32, i32) {
    %c0_i32 = arith.constant 0 : i32
    %c0_i32_0 = arith.constant 0 : i32
    return %arg0, %c0_i32 : i32, i32
  }
}

</mosaic_0001>

<bundles_post_ra>
// kernel: tpu_custom_call.1
= control target key start
LH: loop header
LB: loop body
LE: loop exit
PB: predicated region body
PF: predicated region fallthrough
CT: control target
= control target key end

     0   :  { %6 = vsyncpa [#allocation3], 0  ;;  %s137_s0 = inlined_call_operand.hbm [shape: f32[1,2048], index: 0, kind: input, shape index: {}]   ;;  %s138_s1 = inlined_call_operand.hbm [shape: f32[1,2048], index: 1, kind: output, shape index: {}]  }
   0x1   :  { %7 = vsyncpa [#allocation4], 0  ;;  %s13_s8 = sshll.u32 %s137_s0, 4  ;;  %s118_s9 = smov [#allocation2]   ;;  %s14_s8 = int_to_ptr.hbm [resolvable:$true] %s13_s8 }
   0x2   :  { %s15_s10 = sshll.u32 %s118_s9, 4  ;;  %s16_s10 = int_to_ptr.vmem [resolvable:$true] %s15_s10 }
   0x3   :  { %18 = dma.hbm_to_vmem [thread:$0]  %s14_s8, 256, %s16_s10, [#allocation3]  }
   0x4   :  { %114 = dma.done.wait [#allocation3], 256  }
   0x5   :  { %115 = vsyncadd [#allocation3], 4294967040  ;;  %v119_v0 = vmov 6.0   ;;  %v23_v2 = vld [vmem:[#allocation2] sm:$0xff]  ;;  %v24_v3 = vld [vmem:[#allocation2 + $0x8] sm:$0xff]  ;;  %s120_s0 = smov [#allocation5]  }
   0x6   :  { %64 = vrcp.f32 %v119_v0  ;;  %v25_v4 = vadd.f32 3.0, %v23_v2  ;;  %v26_v6 = vadd.f32 3.0, %v24_v3  ;;  %s49_s11 = sshll.u32 %s120_s0, 4  ;;  %s51_s14 = sshll.u32 %s138_s1, 4  ;;  %s50_s11 = int_to_ptr.vmem [resolvable:$true] %s49_s11  ;;  %s52_s14 = int_to_ptr.hbm [resolvable:$true] %s51_s14 }
   0x8   :  { %v27_v7 = vmax.f32 %v25_v4, 0.0  ;;  %v28_v9 = vmax.f32 %v26_v6, 0.0 }
   0xa   :  { %v29_v11 = vmin.f32 %v27_v7, 6.0  ;;  %v30_v12 = vmin.f32 %v28_v9, 6.0 }
   0xc   :  { %v65_v1 = vpop.eup %64 }
   0xd   :  { %v32_v5 = vmul.f32 6.0, %v65_v1  ;;  %vm36_vm0 = vweird.f32 %v65_v1 }
   0xf   :  { %v33_v8 = vsub.f32 1.0, %v32_v5 }
  0x11   :  { %v34_v10 = vmul.f32 %v65_v1, %v33_v8 }
  0x13   :  { %v35_v13 = vadd.f32 %v65_v1, %v34_v10 }
  0x15   :  { %v37_v14 = vsel %vm36_vm0, %v65_v1, %v35_v13 }
  0x16   :  { %v38_v15 = vmul.f32 %v37_v14, %v29_v11  ;;  %v39_v16 = vmul.f32 %v37_v14, %v30_v12 }
  0x18   :  { %v40_v17 = vmul.f32 %v38_v15, %v23_v2  ;;  %v41_v18 = vmul.f32 %v39_v16, %v24_v3 }
  0x1a   :  { %42 = vst [vmem:[#allocation5] sm:$0xff] %v40_v17 }
  0x1b   :  { %43 = vst [vmem:[#allocation5 + $0x8] sm:$0xff] %v41_v18 }
  0x1c   :  { %54 = dma.vmem_to_hbm [thread:$0]  %s50_s11, 256, %s52_s14, [#allocation4]  }
  0x1d   :  { %116 = dma.done.wait [#allocation4], 256  }
  0x1e   :  { %117 = vsyncadd [#allocation4], 4294967040 }
  0x1f   :  { %59 = vsyncpa [#allocation3], 1 }
  0x20   :  { %60 = vsyncpa [#allocation4], 1 }

</bundles_post_ra>
